<compile_context>
chip_gen: v7x
topology: tpu7x:2x2x1
jax: 0.10.0
libtpu: 0.0.40
codegen_flags: <defaults>
</compile_context>

<pallas_src>
import functools

import jax
import jax.numpy as jnp
from jax.experimental import pallas as pl
from jax.experimental.pallas import tpu as pltpu


def _round_up(n: int, m: int) -> int:
    return ((n + m - 1) // m) * m


def _tv_kernel(masks_ref, x_ref, o_ref, *, H: int, W: int):
    """One grid step over a (nblk, H*W) slab of flattened image planes.

    masks_ref: (2, H*W) f32, resident in VMEM (constant index_map):
      row 0 = [j < (H-1)*W] / count_h   (vertical-diff validity + normalization)
      row 1 = [j % W != W-1] / count_w  (horizontal-diff validity + normalization)
    """
    x = x_ref[...].astype(jnp.float32)              # (nblk, L)
    L = x.shape[-1]

    total = None
    if H > 1:
        # x[h+1, w] - x[h, w] == x[j + W] - x[j] on the flattened plane.
        dh = pltpu.roll(x, L - W, 1) - x            # XLU lane rotation
        total = dh * dh * masks_ref[0:1, :]
    if W > 1:
        # x[h, w+1] - x[h, w] == x[j + 1] - x[j] on the flattened plane.
        dw = pltpu.roll(x, L - 1, 1) - x
        t = dw * dw * masks_ref[1:2, :]
        total = t if total is None else total + t

    part = jnp.sum(total) if total is not None else jnp.float32(0.0)
    # Single full-lane (unmasked) store of this block's partial sum.
    o_ref[...] = jnp.full(o_ref.shape, part, o_ref.dtype)


def tv_loss(x, tv_loss_weight: float = 1.0, *, target_block_bytes: int = 12 * 1024 * 1024):
    """Total-variation loss matching the PyTorch TVLoss.forward semantics."""
    B, C, H, W = x.shape
    N = B * C
    L = H * W
    itemsize = jnp.dtype(x.dtype).itemsize

    count_h = C * max(H - 1, 0) * W
    count_w = C * H * max(W - 1, 0)

    # Lane-dense flattening: one row per (b, c) plane, contiguous in HBM.
    xf = x.reshape(N, L)

    # Precomputed boundary masks with 1/count folded in (max(.,1) only avoids a
    # Python div-by-zero for degenerate H==1 / W==1; those terms are masked out).
    j = jnp.arange(L, dtype=jnp.int32)
    mh = jnp.where(j < (H - 1) * W, 1.0 / max(count_h, 1), 0.0)
    mw = jnp.where((j % W) != (W - 1), 1.0 / max(count_w, 1), 0.0)
    masks = jnp.stack([mh, mw], axis=0).astype(jnp.float32)        # (2, L)

    # --- per-generation VMEM budgeting --------------------------------------
    try:
        vmem_cap = int(getattr(pltpu.get_tpu_info(), "vmem_capacity_bytes", 0)) \
            or 64 * 1024 * 1024
    except Exception:  # query unavailable: assume the smallest (v7x) VMEM
        vmem_cap = 64 * 1024 * 1024
    vmem_budget = max(16 * 1024 * 1024, int(0.6 * vmem_cap))

    # --- block sizing (dtype-aware sublane tile, f32-equivalent bytes) ------
    sub = max(8, 32 // itemsize)              # 8 f32 / 16 bf16 / 32 int8
    plane_f32_bytes = L * 4                   # all temporaries are f32
    # ~2x double-buffered input + ~4 f32 temporaries per block => /6 headroom.
    block_budget = min(int(target_block_bytes), vmem_budget // 6)
    nblk = max(sub, (block_budget // max(plane_f32_bytes, 1)) // sub * sub)

    padded_to_sub = _round_up(N, sub)
    # Keep >= 2 grid steps when possible (megacore sharding + DMA/compute overlap).
    if padded_to_sub >= 2 * sub:
        nblk = min(nblk, max(sub, (padded_to_sub // 2) // sub * sub))
    nblk = min(nblk, padded_to_sub)
    # TODO(synk): add an H-tiled (plane x row-block with one-row halo) path for
    # huge planes where even a single sublane-tile block exceeds the VMEM budget.

    padded_N = _round_up(N, nblk)
    if padded_N != N:
        # Zero planes contribute 0 to the sum.
        xf = jnp.concatenate([xf, jnp.zeros((padded_N - N, L), xf.dtype)], axis=0)
    num_blocks = padded_N // nblk

    parts = pl.pallas_call(
        functools.partial(_tv_kernel, H=H, W=W),
        out_shape=jax.ShapeDtypeStruct((num_blocks, 1, 128), jnp.float32),
        grid_spec=pltpu.PrefetchScalarGridSpec(
            num_scalar_prefetch=0,
            grid=(num_blocks,),
            in_specs=[
                pl.BlockSpec((2, L), lambda i: (0, 0)),      # masks: resident
                pl.BlockSpec((nblk, L), lambda i: (i, 0)),   # planes: streamed
            ],
            out_specs=pl.BlockSpec((1, 1, 128), lambda i: (i, 0, 0)),
        ),
        compiler_params=pltpu.CompilerParams(
            dimension_semantics=("parallel",),
            vmem_limit_bytes=int(vmem_budget),
        ),
    )(masks, xf)

    # total = h_tv / count_h + w_tv / count_w  (normalization folded into masks)
    total = jnp.sum(parts[:, 0, 0])
    return tv_loss_weight * 2.0 * total / B


def _tv_loss_ref(x, tv_loss_weight: float = 1.0):
    # Pure-JAX reference (mirrors the PyTorch forward exactly).
    B, C, H, W = x.shape
    xf = x.astype(jnp.float32)
    h_tv = jnp.sum((xf[:, :, 1:, :] - xf[:, :, : H - 1, :]) ** 2)
    w_tv = jnp.sum((xf[:, :, :, 1:] - xf[:, :, :, : W - 1]) ** 2)
    count_h = C * (H - 1) * W
    count_w = C * H * (W - 1)
    return tv_loss_weight * 2.0 * (h_tv / count_h + w_tv / count_w) / B


if __name__ == "__main__":
    key = jax.random.PRNGKey(0)
    x = jax.random.normal(key, (2, 4, 16, 16), dtype=jnp.float32)

    out = jax.block_until_ready(tv_loss(x, tv_loss_weight=1.0))
    ref = _tv_loss_ref(x, tv_loss_weight=1.0)
    assert jnp.allclose(out, ref, rtol=1e-5, atol=1e-5), (out, ref)

    print("KERNEL_OK")
</pallas_src>

<mosaic_0001>
module attributes {stable_mosaic.version = 11 : i64} {
  func.func @_tv_kernel(%arg0: i32, %arg1: memref<2x256xf32, #tpu.memory_space<vmem>>, %arg2: memref<8x256xf32, #tpu.memory_space<vmem>>, %arg3: memref<1x1x128xf32, #tpu.memory_space<vmem>>) attributes {dimension_semantics = [#tpu.dimension_semantics<parallel>], iteration_bounds = array<i64: 1>, scalar_prefetch = 0 : i64, scratch_operands = 0 : i64, tpu.core_type = #tpu.core_type<tc>, window_params = [{pipeline_mode = #tpu.pipeline_mode<synchronous>, transform_indices = @transform_0, window_bounds = array<i64: 2, 256>}, {transform_indices = @transform_1, window_bounds = array<i64: 8, 256>}, {transform_indices = @transform_2, window_bounds = array<i64: 1, 1, 128>}]} {
    %c0 = arith.constant 0 : index
    %c0_0 = arith.constant 0 : index
    %0 = vector.load %arg2[%c0, %c0_0] : memref<8x256xf32, #tpu.memory_space<vmem>>, vector<8x256xf32>
    %c240_i32 = arith.constant 240 : i32
    %1 = tpu.dynamic_rotate %0 by %c240_i32 dim 1 : vector<8x256xf32>, i32 -> vector<8x256xf32>
    %2 = arith.subf %1, %0 : vector<8x256xf32>
    %3 = arith.mulf %2, %2 : vector<8x256xf32>
    %c0_1 = arith.constant 0 : index
    %c0_2 = arith.constant 0 : index
    %4 = vector.load %arg1[%c0_1, %c0_2] : memref<2x256xf32, #tpu.memory_space<vmem>>, vector<1x256xf32>
    %5 = vector.broadcast %4 : vector<1x256xf32> to vector<8x256xf32>
    %6 = arith.mulf %3, %5 : vector<8x256xf32>
    %c255_i32 = arith.constant 255 : i32
    %7 = tpu.dynamic_rotate %0 by %c255_i32 dim 1 : vector<8x256xf32>, i32 -> vector<8x256xf32>
    %8 = arith.subf %7, %0 : vector<8x256xf32>
    %9 = arith.mulf %8, %8 : vector<8x256xf32>
    %c1 = arith.constant 1 : index
    %c0_3 = arith.constant 0 : index
    %10 = vector.load %arg1[%c1, %c0_3] : memref<2x256xf32, #tpu.memory_space<vmem>>, vector<1x256xf32>
    %11 = vector.broadcast %10 : vector<1x256xf32> to vector<8x256xf32>
    %12 = arith.mulf %9, %11 : vector<8x256xf32>
    %13 = arith.addf %6, %12 : vector<8x256xf32>
    %14 = vector.shape_cast %13 : vector<8x256xf32> to vector<1x8x256xf32>
    %cst = arith.constant dense<0.000000e+00> : vector<1xf32>
    %15 = vector.multi_reduction <add>, %14, %cst [1, 2] : vector<1x8x256xf32> to vector<1xf32>
    %16 = vector.shape_cast %15 : vector<1xf32> to vector<1x1x1xf32>
    %17 = vector.extract %16[0, 0, 0] : f32 from vector<1x1x1xf32>
    %18 = vector.broadcast %17 : f32 to vector<1x1x128xf32>
    %c0_4 = arith.constant 0 : index
    %c0_5 = arith.constant 0 : index
    %c0_6 = arith.constant 0 : index
    %19 = vector.load %arg3[%c0_4, %c0_5, %c0_6] : memref<1x1x128xf32, #tpu.memory_space<vmem>>, vector<1x1x128xf32>
    tpu.vector_store %arg3[%c0_4, %c0_5, %c0_6], %18 {strides = array<i32>} : memref<1x1x128xf32, #tpu.memory_space<vmem>>, vector<1x1x128xf32>,
    return
  }
  func.func @transform_0(%arg0: i32) -> (i32, i32) {
    %c0_i32 = arith.constant 0 : i32
    %c0_i32_0 = arith.constant 0 : i32
    %c0_i32_1 = arith.constant 0 : i32
    return %c0_i32, %c0_i32_0 : i32, i32
  }
  func.func @transform_1(%arg0: i32) -> (i32, i32) {
    %c0_i32 = arith.constant 0 : i32
    %c0_i32_0 = arith.constant 0 : i32
    return %arg0, %c0_i32 : i32, i32
  }
  func.func @transform_2(%arg0: i32) -> (i32, i32, i32) {
    %c0_i32 = arith.constant 0 : i32
    %c0_i32_0 = arith.constant 0 : i32
    %c0_i32_1 = arith.constant 0 : i32
    return %arg0, %c0_i32, %c0_i32_0 : i32, i32, i32
  }
}

</mosaic_0001>

<bundles_post_ra>
// kernel: tpu_custom_call.1
= control target key start
LH: loop header
LB: loop body
LE: loop exit
PB: predicated region body
PF: predicated region fallthrough
CT: control target
= control target key end

     0   :  { %7 = vsyncpa [#allocation3], 0  ;;  %s256_s0 = inlined_call_operand.hbm [shape: f32[2,256], index: 0, kind: input, shape index: {}]   ;;  %s257_s1 = inlined_call_operand.hbm [shape: f32[8,256], index: 1, kind: input, shape index: {}]   ;;  %s258_s2 = inlined_call_operand.hbm [shape: f32[1,1,128], index: 2, kind: output, shape index: {}]  }
   0x1   :  { %8 = vsyncpa [#allocation6], 0 }
   0x2   :  { %9 = vsyncpa [#allocation4], 0  ;;  %s200_s9 = smov [#allocation2]   ;;  %s201_s11 = smov [#allocation5]  }
   0x3   :  { %s16_s10 = sshll.u32 %s200_s9, 4  ;;  %s26_s12 = sshll.u32 %s201_s11, 4  ;;  %s17_s10 = int_to_ptr.vmem [resolvable:$true] %s16_s10  ;;  %s27_s12 = int_to_ptr.vmem [resolvable:$true] %s26_s12 }
   0x4   :  { %s128_s15 = scalar_lea.hbm %s256_s0, 64 }
   0x5   :  { %p129_p0 = scmp.ne.s32.totalorder %s256_s0, %s128_s15  ;;  %p132_p1 = scmp.lt.u32.totalorder %s128_s15, %s256_s0 }
   0x7   :  { %p134_p2 = pnand %p132_p1, %p129_p0 }
   0x9   :  { %137 = shalt.err (!%p134_p2)
}
   0xa   :  { %s138_s20 = scalar_lea.vmem %s17_s10, 64  ;;  %p143_p4 = scmp.lt.s32.totalorder %s17_s10, %s17_s10 }
   0xb   :  { %p139_p3 = scmp.ne.s32.totalorder %s17_s10, %s138_s20  ;;  %p144_p5 = scmp.lt.s32.totalorder %s138_s20, %s138_s20 }
   0xd   :  { %p145_p6 = por %p144_p5, %p143_p4 }
   0xf   :  { %p146_p7 = pnand %p145_p6, %p139_p3 }
  0x11   :  { %149 = shalt.err (!%p146_p7)
}
  0x12   :  { %19 = dma.hbm_to_vmem [thread:$0]  %s256_s0, 64, %s17_s10, [#allocation3]  }
  0x13   :  { %s150_s25 = scalar_lea.hbm %s257_s1, 256 }
  0x14   :  { %p151_p8 = scmp.ne.s32.totalorder %s257_s1, %s150_s25  ;;  %p154_p9 = scmp.lt.u32.totalorder %s150_s25, %s257_s1 }
  0x16   :  { %p156_p10 = pnand %p154_p9, %p151_p8 }
  0x18   :  { %159 = shalt.err (!%p156_p10)
}
  0x19   :  { %s160_s30 = scalar_lea.vmem %s27_s12, 256  ;;  %p165_p12 = scmp.lt.s32.totalorder %s27_s12, %s27_s12 }
  0x1a   :  { %p161_p11 = scmp.ne.s32.totalorder %s27_s12, %s160_s30  ;;  %p166_p13 = scmp.lt.s32.totalorder %s160_s30, %s160_s30 }
  0x1c   :  { %p167_p0 = por %p166_p13, %p165_p12 }
  0x1e   :  { %p168_p1 = pnand %p167_p0, %p161_p11 }
  0x20   :  { %171 = shalt.err (!%p168_p1)
}
  0x21   :  { %29 = dma.hbm_to_vmem [thread:$0]  %s257_s1, 256, %s27_s12, [#allocation6]  }
  0x22   :  { %194 = dma.done.wait [#allocation3], 64  }
  0x23   :  { %195 = vsyncadd [#allocation3], 4294967232 }
  0x24   :  { %196 = dma.done.wait [#allocation6], 256  }
  0x25   :  { %197 = vsyncadd [#allocation6], 4294967040  ;;  %v36_v0 = vld [vmem:[#allocation5] sm:$0xff]  ;;  %s202_s4 = smov 127   ;;  %s203_s5 = smov 112   ;;  %v37_v1 = vld [vmem:[#allocation5 + $0x8] sm:$0xff]  ;;  %v42_v2 = vlaneseq }
  0x26   :  { %65 = vrot.lane.b32.xlu1 %v36_v0, %s202_s4  ;;  %38 = vrot.lane.b32.xlu0 %v36_v0, %s203_s5  ;;  %v77_v9 = vld [vmem:[#allocation2 + $0x1] ss:$2 sm:$0x3]  ;;  %v51_v10 = vld [vmem:[#allocation2] ss:$2 sm:$0x3] }
  0x27   :  { %v54_v3 = vshrl.u32 %v42_v2, 7  ;;  %v43_v4 = vand.u32 127, %v42_v2  ;;  %s204_s1 = smov [#allocation7]  }
  0x28   :  { %s111_s6 = sshll.u32 %s204_s1, 4  ;;  %s112_s6 = int_to_ptr.vmem [resolvable:$true] %s111_s6 }
  0x29   :  { %v55_v7 = vsub.s32 0, %v54_v3  ;;  %v59_v8 = vsub.s32 1, %v54_v3  ;;  %vm69_vm0 = vcmp.lt.s32.totalorder %v43_v4, 127  ;;  %vm44_vm1 = vcmp.lt.s32.totalorder %v43_v4, 112  ;;  %s172_s8 = scalar_lea.vmem %s112_s6, 16  ;;  %s176_s9 = scalar_lea.vmem %s112_s6, 32 }
  0x2a   :  { %67 = vrot.lane.b32.xlu1 %v37_v1, %s202_s4  ;;  %40 = vrot.lane.b32.xlu0 %v37_v1, %s203_s5  ;;  %p173_p2 = scmp.ne.s32.totalorder %s112_s6, %s172_s8  ;;  %p177_p3 = scmp.lt.s32.totalorder %s112_s6, %s112_s6 }
  0x2b   :  { %v82_v11 = vrot.slane %v77_v9, %v55_v7  ;;  %v86_v12 = vrot.slane %v77_v9, %v59_v8  ;;  %v56_v14 = vrot.slane %v51_v10, %v55_v7  ;;  %v60_v15 = vrot.slane %v51_v10, %v59_v8  ;;  %p178_p4 = scmp.lt.s32.totalorder %s176_s9, %s172_s8 }
  0x2d   :  { %p179_p5 = por %p178_p4, %p177_p3 }
  0x2f   :  { %p180_p6 = pnand %p179_p5, %p173_p2 }
  0x98   :  { %v66_v5 = vpop.permute.xlu1 %65  ;;  %v39_v6 = vpop.permute.xlu0 %38 }
  0x9c   :  { %v68_v13 = vpop.permute.xlu1 %67  ;;  %v41_v16 = vpop.permute.xlu0 %40 }
  0x9d   :  { %v70_v17 = vsel %vm69_vm0, %v66_v5, %v68_v13  ;;  %v71_v18 = vsel %vm69_vm0, %v68_v13, %v66_v5  ;;  %v45_v19 = vsel %vm44_vm1, %v39_v6, %v41_v16  ;;  %v46_v20 = vsel %vm44_vm1, %v41_v16, %v39_v6 }
  0x9e   :  { %v72_v21 = vsub.f32 %v70_v17, %v36_v0  ;;  %v73_v22 = vsub.f32 %v71_v18, %v37_v1  ;;  %v47_v23 = vsub.f32 %v45_v19, %v36_v0  ;;  %v48_v24 = vsub.f32 %v46_v20, %v37_v1 }
  0xa0   :  { %v74_v25 = vmul.f32 %v72_v21, %v72_v21  ;;  %v75_v26 = vmul.f32 %v73_v22, %v73_v22  ;;  %v49_v27 = vmul.f32 %v47_v23, %v47_v23  ;;  %v50_v28 = vmul.f32 %v48_v24, %v48_v24 }
  0xa2   :  { %v89_v29 = vmul.f32 %v82_v11, %v74_v25  ;;  %v90_v30 = vmul.f32 %v86_v12, %v75_v26  ;;  %v63_v31 = vmul.f32 %v56_v14, %v49_v27  ;;  %v64_v32 = vmul.f32 %v60_v15, %v50_v28 }
  0xa4   :  { %v91_v33 = vadd.f32 %v89_v29, %v63_v31  ;;  %v92_v34 = vadd.f32 %v90_v30, %v64_v32 }
  0xa6   :  { %v93_v35 = vadd.f32 %v92_v34, %v91_v33 }
  0xa8   :  { %94 = vadd.xlane.f32.xlu0 %v93_v35 }
 0x135   :  { %v95_v36 = vpop.xlane.xlu0 %94 }
 0x136   :  { %v96_v37 = vrot.slane %v95_v36, 4 }
 0x138   :  { %v97_v38 = vadd.f32 %v96_v37, %v95_v36 }
 0x13a   :  { %v98_v39 = vrot.slane %v97_v38, 2 }
 0x13c   :  { %v99_v40 = vadd.f32 %v98_v39, %v97_v38 }
 0x13e   :  { %v100_v41 = vrot.slane %v99_v40, 1 }
 0x140   :  { %v101_v42 = vadd.f32 %v100_v41, %v99_v40 }
 0x142   :  { %121 = vpush %v101_v42 }
 0x173   :  { %s122_s7 = spop %121 }
 0x174   :  { %v103_v43 = vstv %s122_s7 }
 0x175   :  { %104 = vst [vmem:[#allocation7] sm:$0x1] %v103_v43 }
 0x176   :  { %183 = shalt.err (!%p180_p6)
}
 0x177   :  { %s184_s12 = scalar_lea.hbm %s258_s2, 16 }
 0x178   :  { %p185_p7 = scmp.ne.s32.totalorder %s258_s2, %s184_s12  ;;  %p188_p8 = scmp.lt.u32.totalorder %s184_s12, %s258_s2 }
 0x17a   :  { %p190_p9 = pnand %p188_p8, %p185_p7 }
 0x17c   :  { %193 = shalt.err (!%p190_p9)
}
 0x17d   :  { %114 = dma.vmem_to_hbm [thread:$0]  %s112_s6, 16, %s258_s2, [#allocation4]  }
 0x17e   :  { %198 = dma.done.wait [#allocation4], 16  }
 0x17f   :  { %199 = vsyncadd [#allocation4], 4294967280 }
 0x180   :  { %118 = vsyncpa [#allocation3], 1 }
 0x181   :  { %119 = vsyncpa [#allocation6], 1 }
 0x182   :  { %120 = vsyncpa [#allocation4], 1 }

</bundles_post_ra>
